<compile_context>
chip_gen: v5e
topology: v5e:2x2
jax: 0.10.0
libtpu: 0.0.40
codegen_flags: <defaults>
</compile_context>

<pallas_src>
import functools

import jax
import jax.numpy as jnp
from jax.experimental import pallas as pl
from jax.experimental.pallas import tpu as pltpu


# ---------------------------------------------------------------------------
# Small helpers
# ---------------------------------------------------------------------------

def _round_up(x, m):
    return ((x + m - 1) // m) * m


@functools.lru_cache(maxsize=None)
def _vmem_limit_bytes():
    """Generation-aware scoped-VMEM limit."""
    cap = None
    try:
        cap = int(pltpu.get_tpu_info().vmem_capacity_bytes)
    except Exception:
        cap = None
    if cap is not None and cap >= (96 << 20):      # v5e / v6e (128 MiB parts)
        return min(cap - (28 << 20), 100 << 20)
    if cap is not None and cap < (64 << 20):       # defensive: unknown small part
        return max(cap - (16 << 20), 16 << 20)
    return 48 << 20                                # v7x (64 MiB) or unknown


def _vmem_budget():
    # The estimates below already account for double-buffering, so compare them
    # against the full limit minus a fixed headroom (not limit / 2).
    return _vmem_limit_bytes() - (4 << 20)


def _compiler_params(dimension_semantics):
    return pltpu.CompilerParams(dimension_semantics=dimension_semantics,
                                vmem_limit_bytes=_vmem_limit_bytes())


def _choose_m_tiling(M, max_t=512):
    """Return (padded_M, TM) with TM % 8 == 0 and TM | padded_M, preferring
    large tiles, >= 2 grid blocks (megacore) and minimal row padding."""
    Mp = _round_up(M, 8)
    if Mp <= max_t:
        if Mp >= 256 and Mp % 16 == 0:
            return Mp, Mp // 2            # two blocks so both v7x cores get work
        return Mp, Mp                     # single full block
    t = max_t - (max_t % 8)
    while t >= 64:                        # exact multiple-of-8 divisor search
        if Mp % t == 0:
            return Mp, t                  # < 8 rows of padding
        t -= 8
    return _round_up(M, 256), 256         # no decent divisor: 256-aligned pad


def _largest_divisor_tile(M, max_t=512):
    t = min(max_t, M)
    t -= t % 8
    while t >= 8:
        if M % t == 0:
            return t
        t -= 8
    return None


def _pad_cols(w, scale, bias, mult=128):
    """Pad the output-channel (lane) dim to a multiple of `mult`; padded
    channels have zero weights / zero bias so they evaluate to exactly 0."""
    Nc = w.shape[1]
    Np = _round_up(Nc, mult)
    if Np == Nc:
        return w, scale, bias
    return (jnp.pad(w, ((0, 0), (0, Np - Nc))),
            jnp.pad(scale, (0, Np - Nc), constant_values=1.0),
            jnp.pad(bias, (0, Np - Nc)))


# ---------------------------------------------------------------------------
# Fused matmul * scale + bias (+ReLU)   -- every 1x1 conv goes through this
# ---------------------------------------------------------------------------

_K_SINGLE_BLOCK_MAX = 4096


def _mm_kernel_simple(x_ref, w_ref, s_ref, b_ref, o_ref, *, relu):
    y = jnp.dot(x_ref[...], w_ref[...], preferred_element_type=jnp.float32)
    y = y * s_ref[...] + b_ref[...]
    if relu:
        y = jnp.maximum(y, 0.0)
    o_ref[...] = y.astype(o_ref.dtype)


def _mm_kernel_kacc(x_ref, w_ref, s_ref, b_ref, o_ref, acc_ref, *, relu):
    k = pl.program_id(1)

    @pl.when(k == 0)
    def _():
        acc_ref[...] = jnp.zeros_like(acc_ref)

    acc_ref[...] += jnp.dot(x_ref[...], w_ref[...],
                            preferred_element_type=jnp.float32)

    @pl.when(k == pl.num_programs(1) - 1)
    def _():
        y = acc_ref[...] * s_ref[...] + b_ref[...]
        if relu:
            y = jnp.maximum(y, 0.0)
        o_ref[...] = y.astype(o_ref.dtype)


def matmul_scale_bias(x, w, scale, bias, relu, out_dtype=jnp.float32):
    """y = maybe_relu((x @ w) * scale + bias).  bf16 MXU inputs, f32 accum."""
    M, K = x.shape
    Nc = w.shape[1]
    xb = x.astype(jnp.bfloat16)
    wb = w.astype(jnp.bfloat16)
    s2 = scale.astype(jnp.float32).reshape(1, Nc)
    b2 = bias.astype(jnp.float32).reshape(1, Nc)

    Mp, TM = _choose_m_tiling(M)
    if Mp != M:
        xb = jnp.pad(xb, ((0, Mp - M), (0, 0)))

    if K <= _K_SINGLE_BLOCK_MAX:
        # Full-K block: no K padding, no reduction axis, no scratch accumulator.
        out = pl.pallas_call(
            functools.partial(_mm_kernel_simple, relu=relu),
            out_shape=jax.ShapeDtypeStruct((Mp, Nc), out_dtype),
            grid_spec=pltpu.PrefetchScalarGridSpec(
                num_scalar_prefetch=0,
                grid=(Mp // TM,),
                in_specs=[
                    pl.BlockSpec((TM, K), lambda i: (i, 0)),
                    pl.BlockSpec((K, Nc), lambda i: (0, 0)),
                    pl.BlockSpec((1, Nc), lambda i: (0, 0)),
                    pl.BlockSpec((1, Nc), lambda i: (0, 0)),
                ],
                out_specs=pl.BlockSpec((TM, Nc), lambda i: (i, 0)),
            ),
            compiler_params=_compiler_params(("parallel",)),
        )(xb, wb, s2, b2)
    else:
        # Large K (im2col fallback path only): K-accumulation grid.
        if K % 1024 == 0:
            TK, Kp = 1024, K
        elif K % 512 == 0:
            TK, Kp = 512, K
        else:
            TK = 512
            Kp = _round_up(K, TK)
            xb = jnp.pad(xb, ((0, 0), (0, Kp - K)))
            wb = jnp.pad(wb, ((0, Kp - K), (0, 0)))
        out = pl.pallas_call(
            functools.partial(_mm_kernel_kacc, relu=relu),
            out_shape=jax.ShapeDtypeStruct((Mp, Nc), out_dtype),
            grid_spec=pltpu.PrefetchScalarGridSpec(
                num_scalar_prefetch=0,
                grid=(Mp // TM, Kp // TK),
                in_specs=[
                    pl.BlockSpec((TM, TK), lambda i, k: (i, k)),
                    pl.BlockSpec((TK, Nc), lambda i, k: (k, 0)),
                    pl.BlockSpec((1, Nc), lambda i, k: (0, 0)),
                    pl.BlockSpec((1, Nc), lambda i, k: (0, 0)),
                ],
                out_specs=pl.BlockSpec((TM, Nc), lambda i, k: (i, 0)),
                scratch_shapes=[pltpu.VMEM((TM, Nc), jnp.float32)],
            ),
            compiler_params=_compiler_params(("parallel", "arbitrary")),
        )(xb, wb, s2, b2)
    return out[:M] if Mp != M else out


# ---------------------------------------------------------------------------
# 3x3 (dilated) conv + BN + ReLU  (+ optional fused trailing 1x1 projection)
#   grid = (N, Cin-chunks); Cin-chunk axis is the reduction ('arbitrary')
# ---------------------------------------------------------------------------

def _conv3x3_kernel(*refs, H, Wq, d, off, n_kc, relu, has_proj):
    if has_proj:
        x_ref, w_ref, s_ref, b_ref, w2_ref, b2_ref, o_ref, acc_ref, col_ref = refs
    else:
        x_ref, w_ref, s_ref, b_ref, o_ref, acc_ref, col_ref = refs
    tc = x_ref.shape[-1]
    Hd = H + 2 * d
    HWq = H * Wq

    # Stage the three kx column shifts once (3 relayout copies instead of 9);
    # every ky tap is then an aligned, contiguous row slice of a staged buffer.
    for kx in range(3):
        c0 = off + kx * d
        col_ref[kx] = x_ref[0, off:off + Hd, c0:c0 + Wq, :].reshape(Hd * Wq, tc)

    part = None
    for ky in range(3):
        r0 = ky * d * Wq                          # multiple of 8 (Wq % 8 == 0)
        for kx in range(3):
            win = col_ref[kx, r0:r0 + HWq, :]
            p = jnp.dot(win, w_ref[ky * 3 + kx],
                        preferred_element_type=jnp.float32)
            part = p if part is None else part + p

    if n_kc > 1:
        kc = pl.program_id(1)

        @pl.when(kc == 0)
        def _():
            acc_ref[...] = part

        @pl.when(kc > 0)
        def _():
            acc_ref[...] += part

    def _epilogue():
        acc = acc_ref[...] if n_kc > 1 else part
        y = acc * s_ref[...] + b_ref[...]
        if relu:
            y = jnp.maximum(y, 0.0)
        if has_proj:
            y = jnp.dot(y.astype(jnp.bfloat16), w2_ref[...],
                        preferred_element_type=jnp.float32) + b2_ref[...]
        o_ref[0] = y.astype(o_ref.dtype)

    if n_kc > 1:
        pl.when(pl.program_id(1) == n_kc - 1)(_epilogue)
    else:
        _epilogue()


def conv3x3_bn_act(xp, H, Wq, d, w_oihw, scale, bias, relu=True,
                   w2=None, b2=None, out_dtype=jnp.bfloat16):
    """3x3 dilated conv (padding=d) + folded BN (+ReLU) (+ fused 1x1 + bias).

    xp: shared zero-padded bf16 NHWC input (N, H + 2*dmax, Wq + 2*dmax, Cp)
        with dmax >= d and Cp >= Cin (extra channels are zero).
    Returns (N, H*Wq, Cfin); output columns >= true W within each row group are
    junk from the width padding and must be ignored by callers.
    """
    N, Hp_tot, Wp_tot, Cp = xp.shape
    dmax = (Hp_tot - H) // 2
    off = dmax - d
    Cout, Cin = w_oihw.shape[:2]
    has_proj = w2 is not None
    Cfin = w2.shape[1] if has_proj else Cout
    Hd, HWq = H + 2 * d, H * Wq

    wt = jnp.transpose(w_oihw, (2, 3, 1, 0)).reshape(9, Cin, Cout)
    if Cp != Cin:
        wt = jnp.pad(wt, ((0, 0), (0, Cp - Cin), (0, 0)))
    wt = wt.astype(jnp.bfloat16)
    s2 = scale.astype(jnp.float32).reshape(1, Cout)
    bb = bias.astype(jnp.float32).reshape(1, Cout)

    out_isz = jnp.dtype(out_dtype).itemsize
    budget = _vmem_budget()

    def _est(tc):
        fixed = HWq * Cout * 4 + 2 * HWq * Cfin * out_isz + 4 * Cout * 4
        if has_proj:
            fixed += 2 * (Cout * Cfin * 2 + Cfin * 4)
        per_chunk = (2 * Hp_tot * Wp_tot * tc * 2      # double-buffered input
                     + 2 * 9 * tc * Cout * 2           # double-buffered weights
                     + 3 * Hd * Wq * tc * 2)           # column-shift scratch
        return fixed + per_chunk

    tc = None
    cands = ([Cp] if Cp <= 512 else []) + [c for c in (512, 256, 128)
                                           if c < Cp and Cp % c == 0]
    for cand in cands:
        if _est(cand) <= budget:
            tc = cand
            break

    if tc is not None:
        n_kc = Cp // tc
        in_specs = [
            pl.BlockSpec((1, Hp_tot, Wp_tot, tc), lambda n, k: (n, 0, 0, k)),
            pl.BlockSpec((9, tc, Cout), lambda n, k: (0, k, 0)),
            pl.BlockSpec((1, Cout), lambda n, k: (0, 0)),
            pl.BlockSpec((1, Cout), lambda n, k: (0, 0)),
        ]
        args = [xp, wt, s2, bb]
        if has_proj:
            in_specs += [pl.BlockSpec((Cout, Cfin), lambda n, k: (0, 0)),
                         pl.BlockSpec((1, Cfin), lambda n, k: (0, 0))]
            args += [w2.astype(jnp.bfloat16),
                     b2.astype(jnp.float32).reshape(1, Cfin)]
        # TODO(synk): for N == 1 with a single Cin chunk one v7x TensorCore is
        # idle; an H-strip (halo) grid axis would restore 2-way parallelism.
        return pl.pallas_call(
            functools.partial(_conv3x3_kernel, H=H, Wq=Wq, d=d, off=off,
                              n_kc=n_kc, relu=relu, has_proj=has_proj),
            out_shape=jax.ShapeDtypeStruct((N, HWq, Cfin), out_dtype),
            grid_spec=pltpu.PrefetchScalarGridSpec(
                num_scalar_prefetch=0,
                grid=(N, n_kc),
                in_specs=in_specs,
                out_specs=pl.BlockSpec((1, HWq, Cfin), lambda n, k: (n, 0, 0)),
                scratch_shapes=[pltpu.VMEM((HWq, Cout), jnp.float32),
                                pltpu.VMEM((3, Hd * Wq, tc), jnp.bfloat16)],
            ),
            compiler_params=_compiler_params(("parallel", "arbitrary")),
        )(*args)

    # Fallback when even a 128-channel chunk does not fit: bf16 im2col + matmul.
    # TODO(synk): an H-strip halo-tiled kernel would remove the 9x patch blowup.
    pat = jnp.concatenate(
        [xp[:, off + ky * d:off + ky * d + H, off + kx * d:off + kx * d + Wq, :]
         for ky in range(3) for kx in range(3)],
        axis=-1).reshape(N * HWq, 9 * Cp)
    y = matmul_scale_bias(pat, wt.reshape(9 * Cp, Cout), scale, bias, relu=relu,
                          out_dtype=jnp.bfloat16 if has_proj else out_dtype)
    if has_proj:
        y = matmul_scale_bias(y, w2, jnp.ones((Cfin,), jnp.float32), b2,
                              relu=False, out_dtype=out_dtype)
    return y.reshape(N, HWq, Cfin)


# ---------------------------------------------------------------------------
# ASPP projection (1x1 over the 5 branches) without materialising the concat
# ---------------------------------------------------------------------------

def _aspp_project_kernel(b0_ref, b1_ref, b2_ref, b3_ref, pool_ref, w_ref,
                         s_ref, bias_ref, o_ref):
    acc = jnp.dot(b0_ref[0], w_ref[0], preferred_element_type=jnp.float32)
    acc = acc + jnp.dot(b1_ref[0], w_ref[1], preferred_element_type=jnp.float32)
    acc = acc + jnp.dot(b2_ref[0], w_ref[2], preferred_element_type=jnp.float32)
    acc = acc + jnp.dot(b3_ref[0], w_ref[3], preferred_element_type=jnp.float32)
    y = (acc + pool_ref[...]) * s_ref[...] + bias_ref[...]
    o_ref[0] = jnp.maximum(y, 0.0).astype(o_ref.dtype)


def aspp_project(branches, pooled_relu, w_proj_oihw, scale, bias,
                 out_dtype=jnp.bfloat16):
    """branches: 4x (N, HWq, 256) bf16;  pooled_relu: (N, 256) f32."""
    N, HWq, C = branches[0].shape
    Cout = w_proj_oihw.shape[0]
    wg = jnp.transpose(w_proj_oihw.reshape(Cout, 5, C), (1, 2, 0))   # (5, C, Cout)
    # Global-pool branch folded in as a per-sample pre-BN additive term.
    pool_bias = jnp.dot(pooled_relu.astype(jnp.float32), wg[4].astype(jnp.float32))

    TM = _largest_divisor_tile(HWq)     # HWq is a multiple of 8 by construction
    out_isz = jnp.dtype(out_dtype).itemsize
    est = None
    if TM is not None:
        est = (2 * 4 * TM * C * 2 + 2 * TM * Cout * out_isz
               + 2 * 4 * C * Cout * 2 + 8 * Cout * 4)

    if TM is not None and est <= _vmem_budget():
        s2 = scale.astype(jnp.float32).reshape(1, Cout)
        bb = bias.astype(jnp.float32).reshape(1, Cout)
        in_specs = [pl.BlockSpec((1, TM, C), lambda n, m: (n, m, 0))
                    for _ in range(4)]
        in_specs += [
            pl.BlockSpec((1, Cout), lambda n, m: (n, 0)),
            pl.BlockSpec((4, C, Cout), lambda n, m: (0, 0, 0)),
            pl.BlockSpec((1, Cout), lambda n, m: (0, 0)),
            pl.BlockSpec((1, Cout), lambda n, m: (0, 0)),
        ]
        return pl.pallas_call(
            _aspp_project_kernel,
            out_shape=jax.ShapeDtypeStruct((N, HWq, Cout), out_dtype),
            grid_spec=pltpu.PrefetchScalarGridSpec(
                num_scalar_prefetch=0,
                grid=(N, HWq // TM),
                in_specs=in_specs,
                out_specs=pl.BlockSpec((1, TM, Cout), lambda n, m: (n, m, 0)),
            ),
            compiler_params=_compiler_params(("parallel", "parallel")),
        )(branches[0].astype(jnp.bfloat16), branches[1].astype(jnp.bfloat16),
          branches[2].astype(jnp.bfloat16), branches[3].astype(jnp.bfloat16),
          pool_bias.astype(jnp.float32), wg[:4].astype(jnp.bfloat16), s2, bb)

    # Fallback: materialise the concat and use the generic fused matmul.
    full = jnp.concatenate(
        [b.astype(jnp.bfloat16) for b in branches]
        + [jnp.broadcast_to(pooled_relu[:, None, :],
                            (N, HWq, C)).astype(jnp.bfloat16)],
        axis=-1)
    w2d = w_proj_oihw.reshape(Cout, 5 * C).T
    y = matmul_scale_bias(full.reshape(N * HWq, 5 * C), w2d, scale, bias,
                          relu=True, out_dtype=out_dtype)
    return y.reshape(N, HWq, Cout)


# ---------------------------------------------------------------------------
# JAX glue: BN folding, bilinear resize
# ---------------------------------------------------------------------------

def bn_fold(gamma, beta, mean, var, eps=1e-5):
    scale = gamma / jnp.sqrt(var + eps)
    return scale, beta - mean * scale


def bilinear_resize_nhwc(x, out_h, out_w, src_h=None, src_w=None,
                         out_dtype=jnp.float32):
    """F.interpolate(mode='bilinear', align_corners=False) semantics.
    src_h/src_w: true source extents if x carries padded rows/columns."""
    N, H, W, C = x.shape
    sh = H if src_h is None else src_h
    sw = W if src_w is None else src_w
    if (sh, sw) == (out_h, out_w):
        return x[:, :sh, :sw, :].astype(out_dtype)
    xf = x.astype(jnp.float32)

    def coords(in_size, out_size):
        scale = in_size / out_size
        src = (jnp.arange(out_size, dtype=jnp.float32) + 0.5) * scale - 0.5
        src = jnp.maximum(src, 0.0)
        i0 = jnp.minimum(jnp.floor(src).astype(jnp.int32), in_size - 1)
        i1 = jnp.minimum(i0 + 1, in_size - 1)
        return i0, i1, src - i0.astype(jnp.float32)

    h0, h1, fh = coords(sh, out_h)
    w0, w1, fw = coords(sw, out_w)
    r0, r1 = xf[:, h0], xf[:, h1]
    fw_ = fw[None, None, :, None]
    top = r0[:, :, w0] * (1.0 - fw_) + r0[:, :, w1] * fw_
    bot = r1[:, :, w0] * (1.0 - fw_) + r1[:, :, w1] * fw_
    fh_ = fh[None, :, None, None]
    return (top * (1.0 - fh_) + bot * fh_).astype(out_dtype)


# ---------------------------------------------------------------------------
# Parameter initialization (deterministic, matches _init_weight semantics)
# ---------------------------------------------------------------------------

def _conv_w(key, cout, cin, kh, kw):
    # nn.init.normal_(weight, mean=0, std=0.001)
    return 0.001 * jax.random.normal(key, (cout, cin, kh, kw), jnp.float32)


def _bn(c):
    # weight=1, bias=0; eval-mode running stats mean=0, var=1
    return dict(gamma=jnp.ones((c,), jnp.float32),
                beta=jnp.zeros((c,), jnp.float32),
                mean=jnp.zeros((c,), jnp.float32),
                var=jnp.ones((c,), jnp.float32))


def init_params(key, in_channels, low_level_channels, num_classes, aspp_dilate):
    keys = iter(jax.random.split(key, 16 + 3 * len(num_classes)))
    p = {}
    p['project_w'] = _conv_w(next(keys), 48, low_level_channels, 1, 1)
    p['project_bn'] = _bn(48)
    p['aspp0_w'] = _conv_w(next(keys), 256, in_channels, 1, 1)
    p['aspp0_bn'] = _bn(256)
    p['aspp_dilate'] = tuple(int(d) for d in aspp_dilate)
    for i, _ in enumerate(aspp_dilate):
        p[f'aspp{i + 1}_w'] = _conv_w(next(keys), 256, in_channels, 3, 3)
        p[f'aspp{i + 1}_bn'] = _bn(256)
    p['aspp_pool_w'] = _conv_w(next(keys), 256, in_channels, 1, 1)
    p['aspp_pool_bn'] = _bn(256)
    p['aspp_proj_w'] = _conv_w(next(keys), 256, 5 * 256, 1, 1)
    p['aspp_proj_bn'] = _bn(256)
    heads = []
    for c in num_classes:
        heads.append(dict(
            w1=_conv_w(next(keys), 256, 304, 3, 3),
            bn=_bn(256),
            w2=_conv_w(next(keys), c, 256, 1, 1),
            b2=0.001 * jax.random.normal(next(keys), (c,), jnp.float32),
        ))
    p['heads'] = heads
    return p


# ---------------------------------------------------------------------------
# Forward pass
# ---------------------------------------------------------------------------

def deeplab_head_v3plus_forward(feature, params):
    """feature: {'low_level': (N,Cll,Hl,Wl), 'out': (N,Cin,Ho,Wo)} in NCHW."""
    # NCHW -> NHWC directly in bf16 (halves the transpose HBM traffic).
    ll = jnp.transpose(feature['low_level'].astype(jnp.bfloat16), (0, 2, 3, 1))
    out = jnp.transpose(feature['out'].astype(jnp.bfloat16), (0, 2, 3, 1))
    N, Hl, Wl, Cll = ll.shape
    _, Ho, Wo, Cin = out.shape
    Wq_o = _round_up(Wo, 8)
    HWq_o = Ho * Wq_o

    # low-level projection: 1x1 conv -> BN -> ReLU, 48 ch padded to 128 lanes
    # (padded channels are exactly 0, matching head weights padded below).
    s, b = bn_fold(**params['project_bn'])
    w_ll, s_ll, b_ll = _pad_cols(params['project_w'].reshape(48, Cll).T, s, b)
    low = matmul_scale_bias(ll.reshape(-1, Cll), w_ll, s_ll, b_ll,
                            relu=True, out_dtype=jnp.bfloat16)
    low = low.reshape(N, Hl, Wl, 128)

    # ----- ASPP 1x1 branch -----
    s, b = bn_fold(**params['aspp0_bn'])
    br0 = matmul_scale_bias(out.reshape(-1, Cin),
                            params['aspp0_w'].reshape(256, Cin).T,
                            s, b, relu=True, out_dtype=jnp.bfloat16)
    br0 = br0.reshape(N, Ho, Wo, 256)
    if Wq_o != Wo:
        br0 = jnp.pad(br0, ((0, 0), (0, 0), (0, Wq_o - Wo), (0, 0)))
    branches = [br0.reshape(N, HWq_o, 256)]

    # ----- ASPP dilated branches: one shared max-dilation zero pad -----
    dilations = params['aspp_dilate']
    dmax = max(dilations)
    cin_extra = 0 if Cin <= 128 else _round_up(Cin, 128) - Cin
    xp = jnp.pad(out, ((0, 0), (dmax, dmax),
                       (dmax, dmax + Wq_o - Wo), (0, cin_extra)))
    for i, d in enumerate(dilations):
        s, b = bn_fold(**params[f'aspp{i + 1}_bn'])
        branches.append(conv3x3_bn_act(xp, Ho, Wq_o, d,
                                       params[f'aspp{i + 1}_w'], s, b,
                                       relu=True, out_dtype=jnp.bfloat16))

    # ASPPPooling: global avg pool -> 1x1 conv -> BN -> ReLU (the broadcast
    # upsample is folded into the projection as a per-sample bias).
    pooled = jnp.mean(out.astype(jnp.float32), axis=(1, 2))          # (N, Cin)
    s, b = bn_fold(**params['aspp_pool_bn'])
    pooled = matmul_scale_bias(pooled, params['aspp_pool_w'].reshape(256, Cin).T,
                               s, b, relu=True, out_dtype=jnp.float32)

    # ASPP projection (1x1 over the 5*256 channels, concat never materialised).
    s, b = bn_fold(**params['aspp_proj_bn'])
    aspp_out = aspp_project(branches, pooled, params['aspp_proj_w'], s, b,
                            out_dtype=jnp.bfloat16)              # (N, HWq_o, 256)
    # TODO(synk): nn.Dropout(0.1) is stochastic in training mode; eval identity.

    # upsample to the low-level resolution (padded-width junk columns are never
    # gathered) and concat: 128 + 256 = 384 channels, lane aligned.
    aspp_up = bilinear_resize_nhwc(aspp_out.reshape(N, Ho, Wq_o, 256),
                                   Hl, Wl, src_w=Wo, out_dtype=jnp.bfloat16)
    feat = jnp.concatenate([low, aspp_up], axis=-1)               # (N,Hl,Wl,384)

    # Heads fused across class groups: one 3x3 conv (Cout=256*nh, BN+ReLU) plus
    # a block-diagonal 1x1 inside the same kernel; logits padded to 128 lanes.
    heads = params['heads']
    nh = len(heads)
    w1_all = jnp.concatenate([h['w1'] for h in heads], axis=0)    # (256*nh,304,3,3)
    w1_all = jnp.concatenate(                                     # 304 -> 384 in-ch
        [w1_all[:, :48], jnp.zeros((256 * nh, 128 - 48, 3, 3), w1_all.dtype),
         w1_all[:, 48:]], axis=1)
    sb = [bn_fold(**h['bn']) for h in heads]
    s_all = jnp.concatenate([x[0] for x in sb])
    b_all = jnp.concatenate([x[1] for x in sb])
    ctot = sum(h['w2'].shape[0] for h in heads)
    cpad = _round_up(ctot, 128)
    w2_blk = jnp.zeros((256 * nh, cpad), jnp.float32)
    off_c = 0
    for i, h in enumerate(heads):
        c = h['w2'].shape[0]
        w2_blk = w2_blk.at[i * 256:(i + 1) * 256, off_c:off_c + c].set(
            h['w2'].reshape(c, 256).T)
        off_c += c
    b2_all = jnp.concatenate([h['b2'] for h in heads]
                             + [jnp.zeros((cpad - ctot,), jnp.float32)])

    Wq_l = _round_up(Wl, 8)
    featp = jnp.pad(feat, ((0, 0), (1, 1), (1, 1 + Wq_l - Wl), (0, 0)))
    y = conv3x3_bn_act(featp, Hl, Wq_l, 1, w1_all, s_all, b_all, relu=True,
                       w2=w2_blk, b2=b2_all, out_dtype=jnp.float32)
    y = y.reshape(N, Hl, Wq_l, cpad)[:, :, :Wl, :ctot]
    return jnp.transpose(y, (0, 3, 1, 2))                         # back to NCHW


# ---------------------------------------------------------------------------
# Main
# ---------------------------------------------------------------------------

if __name__ == "__main__":
    key = jax.random.PRNGKey(0)
    in_channels = 8          # channels of feature['out']
    low_level_channels = 4   # channels of feature['low_level']
    num_classes = [3, 5]
    aspp_dilate = [12, 24, 36]

    kp, k1, k2 = jax.random.split(key, 3)
    params = init_params(kp, in_channels, low_level_channels, num_classes,
                         aspp_dilate)

    feature = {
        'low_level': jax.random.normal(k1, (2, low_level_channels, 16, 16),
                                       jnp.float32),
        'out': jax.random.normal(k2, (2, in_channels, 8, 8), jnp.float32),
    }

    y = deeplab_head_v3plus_forward(feature, params)
    y = jax.block_until_ready(y)
    assert y.shape == (2, sum(num_classes), 16, 16), y.shape
    assert jnp.all(jnp.isfinite(y))
    print("KERNEL_OK")
</pallas_src>

<mosaic_0001>
module attributes {stable_mosaic.version = 11 : i64} {
  func.func @_mm_kernel_simple(%arg0: i32, %arg1: memref<256x4xbf16, #tpu.memory_space<vmem>>, %arg2: memref<4x128xbf16, #tpu.memory_space<vmem>>, %arg3: memref<1x128xf32, #tpu.memory_space<vmem>>, %arg4: memref<1x128xf32, #tpu.memory_space<vmem>>, %arg5: memref<256x128xbf16, #tpu.memory_space<vmem>>) attributes {dimension_semantics = [#tpu.dimension_semantics<parallel>], iteration_bounds = array<i64: 2>, scalar_prefetch = 0 : i64, scratch_operands = 0 : i64, tpu.core_type = #tpu.core_type<tc>, window_params = [{transform_indices = @transform_0, window_bounds = array<i64: 256, 4>}, {pipeline_mode = #tpu.pipeline_mode<synchronous>, transform_indices = @transform_1, window_bounds = array<i64: 4, 128>}, {pipeline_mode = #tpu.pipeline_mode<synchronous>, transform_indices = @transform_2, window_bounds = array<i64: 1, 128>}, {pipeline_mode = #tpu.pipeline_mode<synchronous>, transform_indices = @transform_3, window_bounds = array<i64: 1, 128>}, {transform_indices = @transform_4, window_bounds = array<i64: 256, 128>}]} {
    %c0 = arith.constant 0 : index
    %c0_0 = arith.constant 0 : index
    %0 = vector.load %arg1[%c0, %c0_0] : memref<256x4xbf16, #tpu.memory_space<vmem>>, vector<256x4xbf16>
    %c0_1 = arith.constant 0 : index
    %c0_2 = arith.constant 0 : index
    %1 = vector.load %arg2[%c0_1, %c0_2] : memref<4x128xbf16, #tpu.memory_space<vmem>>, vector<4x128xbf16>
    %cst = arith.constant dense<0.000000e+00> : vector<256x128xf32>
    %2 = tpu.matmul %0, %1, %cst {dimension_numbers = #tpu.dot_dimension_numbers<[1], [0], [0], [1], [0, 0, 1, 1], [], []>} : vector<256x4xbf16>, vector<4x128xbf16>, vector<256x128xf32> -> vector<256x128xf32>
    %c0_3 = arith.constant 0 : index
    %c0_4 = arith.constant 0 : index
    %3 = vector.load %arg3[%c0_3, %c0_4] : memref<1x128xf32, #tpu.memory_space<vmem>>, vector<1x128xf32>
    %4 = vector.broadcast %3 : vector<1x128xf32> to vector<256x128xf32>
    %5 = arith.mulf %2, %4 : vector<256x128xf32>
    %c0_5 = arith.constant 0 : index
    %c0_6 = arith.constant 0 : index
    %6 = vector.load %arg4[%c0_5, %c0_6] : memref<1x128xf32, #tpu.memory_space<vmem>>, vector<1x128xf32>
    %7 = vector.broadcast %6 : vector<1x128xf32> to vector<256x128xf32>
    %8 = arith.addf %5, %7 : vector<256x128xf32>
    %cst_7 = arith.constant 0.000000e+00 : f32
    %9 = vector.broadcast %cst_7 : f32 to vector<256x128xf32>
    %10 = arith.maximumf %8, %9 : vector<256x128xf32>
    %11 = arith.truncf %10 : vector<256x128xf32> to vector<256x128xbf16>
    %c0_8 = arith.constant 0 : index
    %c0_9 = arith.constant 0 : index
    %12 = vector.load %arg5[%c0_8, %c0_9] : memref<256x128xbf16, #tpu.memory_space<vmem>>, vector<256x128xbf16>
    tpu.vector_store %arg5[%c0_8, %c0_9], %11 {strides = array<i32>} : memref<256x128xbf16, #tpu.memory_space<vmem>>, vector<256x128xbf16>,
    return
  }
  func.func @transform_0(%arg0: i32) -> (i32, i32) {
    %c0_i32 = arith.constant 0 : i32
    %c0_i32_0 = arith.constant 0 : i32
    return %arg0, %c0_i32 : i32, i32
  }
  func.func @transform_1(%arg0: i32) -> (i32, i32) {
    %c0_i32 = arith.constant 0 : i32
    %c0_i32_0 = arith.constant 0 : i32
    %c0_i32_1 = arith.constant 0 : i32
    return %c0_i32, %c0_i32_0 : i32, i32
  }
  func.func @transform_2(%arg0: i32) -> (i32, i32) {
    %c0_i32 = arith.constant 0 : i32
    %c0_i32_0 = arith.constant 0 : i32
    %c0_i32_1 = arith.constant 0 : i32
    return %c0_i32, %c0_i32_0 : i32, i32
  }
  func.func @transform_3(%arg0: i32) -> (i32, i32) {
    %c0_i32 = arith.constant 0 : i32
    %c0_i32_0 = arith.constant 0 : i32
    %c0_i32_1 = arith.constant 0 : i32
    return %c0_i32, %c0_i32_0 : i32, i32
  }
  func.func @transform_4(%arg0: i32) -> (i32, i32) {
    %c0_i32 = arith.constant 0 : i32
    %c0_i32_0 = arith.constant 0 : i32
    return %arg0, %c0_i32 : i32, i32
  }
}

</mosaic_0001>

<bundles_post_ra>
// kernel: tpu_custom_call.1
= control target key start
LH: loop header
LB: loop body
LE: loop exit
PB: predicated region body
PF: predicated region fallthrough
CT: control target
= control target key end

     0   :  { %9 = vsyncpa [#allocation3], 0  ;;  %s1242_s0 = inlined_call_operand.vmem [shape: bf16[512,4], index: 0, kind: input, shape index: {}]   ;;  %s1243_s1 = inlined_call_operand.vmem [shape: bf16[4,128], index: 1, kind: input, shape index: {}]   ;;  %s1244_s2 = inlined_call_operand.vmem [shape: f32[1,128], index: 2, kind: input, shape index: {}]   ;;  %s1245_s3 = inlined_call_operand.vmem [shape: f32[1,128], index: 3, kind: input, shape index: {}]   ;;  %s1246_s4 = inlined_call_operand.hbm [shape: bf16[512,128], index: 4, kind: output, shape index: {}]  }
   0x1   :  { %11 = vsyncpa [#allocation3 + $0x1], 0  ;;  %s1042_s15 = smov 0   ;;  %s1044_s16 = smov 0  }
   0x2   :  { %s1046_s17 = smov 0   ;;  %s1048_s18 = smov 0  }
   0x3 LB: > { %s1063_s19 = sadd.s32 4294967295, %s1013_s18   ;;  %s701_s20 = sadd.s32 4294967294, %s1013_s18   ;;  %s1013_s18 = sphi %s1048_s18, %s1252_s18   ;;  %s1009_s17 = sphi %s1046_s17, %s1251_s17   ;;  %s1005_s16 = sphi %s1044_s16, %s1250_s16   ;;  %s1001_s15 = sphi %s1042_s15, %s1249_s15  }
   0x4   : > { %s1067_s21 = sadd.s32 1, %s1013_s18   ;;  %s113_s22 = sadd.s32 1, %s1009_s17 }
   0x5   : > { %s110_s23 = ssub.s32 %s1013_s18, %s1067_s21  ;;  %p123_p0 = scmp.ne.s32.totalorder %s1009_s17, %s1005_s16 }
   0x6   : > { %p111_p1 = scmp.eq.s32.totalorder %s110_s23, 0  ;;  %p124_p2 = scmp.eq.s32.totalorder %s1063_s19, 1 }
   0x7   : > { %p129_p3 = scmp.ne.s32.totalorder %s1005_s16, %s1001_s15  ;;  %p130_p4 = scmp.eq.s32.totalorder %s701_s20, 1 }
   0x8   : > { %s1078_s24 = scalar_select %p111_p1, %s1009_s17, %s113_s22  }
   0x9   : > { %p1080_p5 = por %p124_p2, %p123_p0  ;;  %p1084_p6 = por %p130_p4, %p129_p3 }
   0xa   : > { %p704_p7 = scmp.ge.s32.totalorder %s1013_s18, 1  ;;  %p166_p8 = scmp.lt.s32.totalorder %s1013_s18, 3 }
   0xc   : > { %p167_p9 = pnand %p704_p7, %p166_p8 }
   0xd   : > { %s706_s29 = sshll.u32 (!%p167_p9), %s1063_s19, 5  ;;  %s189_s12 = sand.u32 (!%p167_p9), 1, %s1005_s16  }
   0xe   : > { %170 = sbr.rel (%p167_p9) target bundleno = 226 (0xe2), region = 36  ;;  %p193_p10 = scmp.lt.s32.totalorder (!%p167_p9), %s706_s29, 63 }
   0xf   : > { %s705_s13 = sshll.u32 (!%p167_p9), %s189_s12, 7  ;;  %s809_s20 = sshll.u32 (!%p167_p9), %s1063_s19, 7 }
  0x10   : > { %s1140_s14 = scalar_lea.vmem (!%p167_p9), [#allocation2], %s705_s13  ;;  %s635_s27 = scalar_lea.hbm (!%p167_p9), %s1246_s4, %s809_s20 }
  0x11   : > { %s636_s19 = sshll.u32 (!%p167_p9), %s1140_s14, 4  ;;  %s638_s28 = sshll.u32 (!%p167_p9), %s635_s27, 4  ;;  %s637_s19 = int_to_ptr.vmem [resolvable:$true] %s636_s19  ;;  %s639_s28 = int_to_ptr.hbm [resolvable:$true] %s638_s28 }
  0x12   : > { %s971_s8 = scalar_lea.hbm (!%p167_p9), %s1246_s4, 256 }
  0x13   : > { %v232_v0 = vld [vmem:[%s1243_s1] sm:$0x3]  ;;  %vm362_vm0 = vcmask 1041408   ;;  %s1254_s29 = smov (!%p193_p10, %s706_s29), 63  ;;  %vm313_vm1 = vcmask 31744  }
  0x14   : > { %v364_v1 = vsel %vm362_vm0, %v232_v0, 0  ;;  %s707_s30 = sshll.u32 %s1254_s29, 2  ;;  %v1116_v20 = vld [vmem:[%s1244_s2] ss:$0 sm:$0xff]  ;;  %s624_s29 = scalar_lea.sflag [#allocation3], %s189_s12 }
  0x15   : > { %373 = vmatpush.bf16.msra.mxu0 %v364_v1  ;;  %905 = vmatpush.bf16.msra.mxu1 %v364_v1  ;;  %s196_s7 = scalar_lea.vmem %s1242_s0, %s707_s30  ;;  %v1122_v22 = vld [vmem:[%s1245_s3] ss:$0 sm:$0xff]  ;;  %s965_s30 = sshra.s32 %s639_s28, 4  ;;  %s966_s30 = int_to_ptr.hbm [resolvable:$true] %s965_s30 }
  0x16   : > { %906 = vmatpush.bf16.msra.mxu2 %v364_v1  ;;  %907 = vmatpush.bf16.msra.mxu3 %v364_v1  ;;  %v793_v2 = vld [vmem:[%s196_s7] sm:$0xff]  ;;  %v794_v6 = vld [vmem:[%s196_s7 + $0x8] sm:$0xff]  ;;  %v795_v10 = vld [vmem:[%s196_s7 + $0x10] sm:$0xff]  ;;  %s967_s5 = scalar_lea.hbm %s966_s30, 128  ;;  %p972_p0 = scmp.lt.s32.totalorder %s966_s30, %s1246_s4 }
  0x17   : > { %v797_v3 = vld [vmem:[%s196_s7 + $0x20] sm:$0xff]  ;;  %v798_v7 = vld [vmem:[%s196_s7 + $0x28] sm:$0xff]  ;;  %v799_v11 = vld [vmem:[%s196_s7 + $0x30] sm:$0xff]  ;;  %p968_p11 = scmp.ne.s32.totalorder %s966_s30, %s967_s5  ;;  %p973_p1 = scmp.lt.s32.totalorder %s971_s8, %s967_s5 }
  0x18   : > { %v801_v4 = vld [vmem:[%s196_s7 + $0x40] sm:$0xff]  ;;  %772 = vmatmul.msk.bf16.vlgmr.msra.gmra.mxu0 %vm313_vm1, %v793_v2  ;;  %776 = vmatmul.msk.bf16.vlgmr.msra.gmra.mxu1 %vm313_vm1, %v797_v3  ;;  %v802_v8 = vld [vmem:[%s196_s7 + $0x48] sm:$0xff]  ;;  %v803_v12 = vld [vmem:[%s196_s7 + $0x50] sm:$0xff] }
  0x19   : > { %v805_v5 = vld [vmem:[%s196_s7 + $0x60] sm:$0xff]  ;;  %780 = vmatmul.msk.bf16.vlgmr.msra.gmra.mxu2 %vm313_vm1, %v801_v4  ;;  %v806_v9 = vld [vmem:[%s196_s7 + $0x68] sm:$0xff]  ;;  %v807_v13 = vld [vmem:[%s196_s7 + $0x70] sm:$0xff]  ;;  %p969_p12 = pnand %p968_p11, %p1080_p5  ;;  %p974_p2 = por %p973_p1, %p972_p0 }
  0x1a   : > { %784 = vmatmul.msk.bf16.vlgmr.msra.gmra.mxu3 %vm313_vm1, %v805_v5  ;;  %v796_v14 = vld [vmem:[%s196_s7 + $0x18] sm:$0xff] }
  0x1b   : > { %v800_v15 = vld [vmem:[%s196_s7 + $0x38] sm:$0xff]  ;;  %p970_p13 = pneg %p969_p12 }
  0x1c   : > { %v804_v16 = vld [vmem:[%s196_s7 + $0x58] sm:$0xff] }
  0x1d   : > { %v808_v17 = vld [vmem:[%s196_s7 + $0x78] sm:$0xff]  ;;  %p975_p3 = pnand %p974_p2, %p970_p13 }
  0x28   : > { %773 = vmatmul.msk.bf16.gmra.mxu0 %vm313_vm1, %v794_v6  ;;  %777 = vmatmul.msk.bf16.gmra.mxu1 %vm313_vm1, %v798_v7 }
  0x29   : > { %781 = vmatmul.msk.bf16.gmra.mxu2 %vm313_vm1, %v802_v8 }
  0x2a   : > { %785 = vmatmul.msk.bf16.gmra.mxu3 %vm313_vm1, %v806_v9 }
  0x38   : > { %774 = vmatmul.msk.bf16.gmra.mxu0 %vm313_vm1, %v795_v10  ;;  %778 = vmatmul.msk.bf16.gmra.mxu1 %vm313_vm1, %v799_v11 }
  0x39   : > { %782 = vmatmul.msk.bf16.gmra.mxu2 %vm313_vm1, %v803_v12 }
  0x3a   : > { %786 = vmatmul.msk.bf16.gmra.mxu3 %vm313_vm1, %v807_v13 }
  0x48   : > { %775 = vmatmul.msk.bf16.gmra.mxu0 %vm313_vm1, %v796_v14  ;;  %779 = vmatmul.msk.bf16.gmra.mxu1 %vm313_vm1, %v800_v15 }
  0x49   : > { %783 = vmatmul.msk.bf16.gmra.mxu2 %vm313_vm1, %v804_v16 }
  0x4a   : > { %787 = vmatmul.msk.bf16.gmra.mxu3 %vm313_vm1, %v808_v17 }
  0x95   : > { %v375_v18 = vpop.f32.mrf.mxu0  ;;  %v395_v19 = vpop.f32.mrf.mxu1 }
  0x96   : > { %v459_v21 = vmul.f32 %v1116_v20, %v375_v18  ;;  %v467_v23 = vmul.f32 %v1116_v20, %v395_v19 }
  0x98   : > { %v495_v28 = vadd.f32 %v1122_v22, %v459_v21  ;;  %v503_v29 = vadd.f32 %v1122_v22, %v467_v23 }
  0x9a   : > { %v527_v36 = vmax.f32 %v495_v28, 0.0  ;;  %v535_v37 = vmax.f32 %v503_v29, 0.0 }
  0x9c   : > { %v415_v24 = vpop.f32.mrf.mxu2 }
  0x9d   : > { %v435_v25 = vpop.f32.mrf.mxu3  ;;  %v377_v26 = vpop.f32.mrf.mxu0  ;;  %v475_v34 = vmul.f32 %v1116_v20, %v415_v24 }
  0x9e   : > { %v397_v27 = vpop.f32.mrf.mxu1  ;;  %v460_v30 = vmul.f32 %v1116_v20, %v377_v26  ;;  %v483_v35 = vmul.f32 %v1116_v20, %v435_v25 }
  0x9f   : > { %v468_v31 = vmul.f32 %v1116_v20, %v397_v27  ;;  %v511_v44 = vadd.f32 %v1122_v22, %v475_v34 }
  0xa0   : > { %v496_v32 = vadd.f32 %v1122_v22, %v460_v30  ;;  %v519_v45 = vadd.f32 %v1122_v22, %v483_v35 }
  0xa1   : > { %v504_v33 = vadd.f32 %v1122_v22, %v468_v31  ;;  %v543_v52 = vmax.f32 %v511_v44, 0.0 }
  0xa2   : > { %v528_v38 = vmax.f32 %v496_v32, 0.0  ;;  %v551_v53 = vmax.f32 %v519_v45, 0.0 }
  0xa3   : > { %v536_v39 = vmax.f32 %v504_v33, 0.0 }
  0xa4   : > { %v813_v40 = vpack.c.bf16 %v528_v38, %v527_v36  ;;  %v417_v42 = vpop.f32.mrf.mxu2 }
  0xa5   : > { %v833_v41 = vpack.c.bf16 %v536_v39, %v535_v37  ;;  %v437_v43 = vpop.f32.mrf.mxu3  ;;  %v476_v46 = vmul.f32 %v1116_v20, %v417_v42  ;;  %v380_v48 = vpop.f32.mrf.mxu0 }
  0xa6   : > { %v484_v47 = vmul.f32 %v1116_v20, %v437_v43  ;;  %v400_v49 = vpop.f32.mrf.mxu1  ;;  %814 = vst [vmem:[%s1140_s14] sm:$0xff] %v813_v40   ;;  %v461_v56 = vmul.f32 %v1116_v20, %v380_v48 }
  0xa7   : > { %893 = vst [vmem:[%s1140_s14 + $0x20] sm:$0xff] %v833_v41   ;;  %v512_v50 = vadd.f32 %v1122_v22, %v476_v46  ;;  %v469_v57 = vmul.f32 %v1116_v20, %v400_v49 }
  0xa8   : > { %v520_v51 = vadd.f32 %v1122_v22, %v484_v47  ;;  %v497_v0 = vadd.f32 %v1122_v22, %v461_v56 }
  0xa9   : > { %v544_v54 = vmax.f32 %v512_v50, 0.0  ;;  %v505_v1 = vadd.f32 %v1122_v22, %v469_v57 }
  0xaa   : > { %v552_v55 = vmax.f32 %v520_v51, 0.0  ;;  %v529_v8 = vmax.f32 %v497_v0, 0.0 }
  0xab   : > { %v853_v58 = vpack.c.bf16 %v544_v54, %v543_v52  ;;  %v537_v9 = vmax.f32 %v505_v1, 0.0 }
  0xac   : > { %v873_v59 = vpack.c.bf16 %v552_v55, %v551_v53  ;;  %v420_v60 = vpop.f32.mrf.mxu2 }
  0xad   : > { %v440_v61 = vpop.f32.mrf.mxu3  ;;  %897 = vst [vmem:[%s1140_s14 + $0x40] sm:$0xff] %v853_v58   ;;  %v382_v62 = vpop.f32.mrf.mxu0  ;;  %v477_v6 = vmul.f32 %v1116_v20, %v420_v60 }
  0xae   : > { %v402_v63 = vpop.f32.mrf.mxu1  ;;  %901 = vst [vmem:[%s1140_s14 + $0x60] sm:$0xff] %v873_v59   ;;  %v462_v2 = vmul.f32 %v1116_v20, %v382_v62  ;;  %v485_v7 = vmul.f32 %v1116_v20, %v440_v61 }
  0xaf   : > { %v470_v3 = vmul.f32 %v1116_v20, %v402_v63  ;;  %v513_v16 = vadd.f32 %v1122_v22, %v477_v6 }
  0xb0   : > { %v498_v4 = vadd.f32 %v1122_v22, %v462_v2  ;;  %v521_v17 = vadd.f32 %v1122_v22, %v485_v7 }
  0xb1   : > { %v506_v5 = vadd.f32 %v1122_v22, %v470_v3  ;;  %v545_v26 = vmax.f32 %v513_v16, 0.0 }
  0xb2   : > { %v530_v10 = vmax.f32 %v498_v4, 0.0  ;;  %v553_v27 = vmax.f32 %v521_v17, 0.0 }
  0xb3   : > { %v538_v11 = vmax.f32 %v506_v5, 0.0 }
  0xb4   : > { %v818_v12 = vpack.c.bf16 %v530_v10, %v529_v8  ;;  %v422_v14 = vpop.f32.mrf.mxu2 }
  0xb5   : > { %v838_v13 = vpack.c.bf16 %v538_v11, %v537_v9  ;;  %v442_v15 = vpop.f32.mrf.mxu3  ;;  %v478_v18 = vmul.f32 %v1116_v20, %v422_v14  ;;  %v385_v21 = vpop.f32.mrf.mxu0 }
  0xb6   : > { %v486_v19 = vmul.f32 %v1116_v20, %v442_v15  ;;  %v405_v23 = vpop.f32.mrf.mxu1  ;;  %890 = vst [vmem:[%s1140_s14 + $0x8] sm:$0xff] %v818_v12   ;;  %v463_v30 = vmul.f32 %v1116_v20, %v385_v21 }
  0xb7   : > { %894 = vst [vmem:[%s1140_s14 + $0x28] sm:$0xff] %v838_v13   ;;  %v514_v24 = vadd.f32 %v1122_v22, %v478_v18  ;;  %v471_v31 = vmul.f32 %v1116_v20, %v405_v23 }
  0xb8   : > { %v522_v25 = vadd.f32 %v1122_v22, %v486_v19  ;;  %v499_v38 = vadd.f32 %v1122_v22, %v463_v30 }
  0xb9   : > { %v546_v28 = vmax.f32 %v514_v24, 0.0  ;;  %v507_v39 = vadd.f32 %v1122_v22, %v471_v31 }
  0xba   : > { %v554_v29 = vmax.f32 %v522_v25, 0.0  ;;  %v531_v46 = vmax.f32 %v499_v38, 0.0 }
  0xbb   : > { %v858_v32 = vpack.c.bf16 %v546_v28, %v545_v26  ;;  %v539_v47 = vmax.f32 %v507_v39, 0.0 }
  0xbc   : > { %v878_v33 = vpack.c.bf16 %v554_v29, %v553_v27  ;;  %v425_v34 = vpop.f32.mrf.mxu2 }
  0xbd   : > { %v445_v35 = vpop.f32.mrf.mxu3  ;;  %898 = vst [vmem:[%s1140_s14 + $0x48] sm:$0xff] %v858_v32   ;;  %v387_v36 = vpop.f32.mrf.mxu0  ;;  %v479_v44 = vmul.f32 %v1116_v20, %v425_v34 }
  0xbe   : > { %v407_v37 = vpop.f32.mrf.mxu1  ;;  %902 = vst [vmem:[%s1140_s14 + $0x68] sm:$0xff] %v878_v33   ;;  %v464_v40 = vmul.f32 %v1116_v20, %v387_v36  ;;  %v487_v45 = vmul.f32 %v1116_v20, %v445_v35 }
  0xbf   : > { %v472_v41 = vmul.f32 %v1116_v20, %v407_v37  ;;  %v515_v54 = vadd.f32 %v1122_v22, %v479_v44 }
  0xc0   : > { %v500_v42 = vadd.f32 %v1122_v22, %v464_v40  ;;  %v523_v55 = vadd.f32 %v1122_v22, %v487_v45 }
  0xc1   : > { %v508_v43 = vadd.f32 %v1122_v22, %v472_v41  ;;  %v547_v62 = vmax.f32 %v515_v54, 0.0 }
  0xc2   : > { %v532_v48 = vmax.f32 %v500_v42, 0.0  ;;  %v555_v63 = vmax.f32 %v523_v55, 0.0 }
  0xc3   : > { %v540_v49 = vmax.f32 %v508_v43, 0.0 }
  0xc4   : > { %v823_v50 = vpack.c.bf16 %v532_v48, %v531_v46  ;;  %v427_v52 = vpop.f32.mrf.mxu2 }
  0xc5   : > { %v843_v51 = vpack.c.bf16 %v540_v49, %v539_v47  ;;  %v447_v53 = vpop.f32.mrf.mxu3  ;;  %v480_v56 = vmul.f32 %v1116_v20, %v427_v52  ;;  %v390_v58 = vpop.f32.mrf.mxu0 }
  0xc6   : > { %v488_v57 = vmul.f32 %v1116_v20, %v447_v53  ;;  %v410_v59 = vpop.f32.mrf.mxu1  ;;  %891 = vst [vmem:[%s1140_s14 + $0x10] sm:$0xff] %v823_v50   ;;  %v465_v2 = vmul.f32 %v1116_v20, %v390_v58 }
  0xc7   : > { %895 = vst [vmem:[%s1140_s14 + $0x30] sm:$0xff] %v843_v51   ;;  %v516_v60 = vadd.f32 %v1122_v22, %v480_v56  ;;  %v473_v3 = vmul.f32 %v1116_v20, %v410_v59 }
  0xc8   : > { %v524_v61 = vadd.f32 %v1122_v22, %v488_v57  ;;  %v501_v10 = vadd.f32 %v1122_v22, %v465_v2 }
  0xc9   : > { %v548_v0 = vmax.f32 %v516_v60, 0.0  ;;  %v509_v11 = vadd.f32 %v1122_v22, %v473_v3 }
  0xca   : > { %v556_v1 = vmax.f32 %v524_v61, 0.0  ;;  %v533_v18 = vmax.f32 %v501_v10, 0.0 }
  0xcb   : > { %v863_v4 = vpack.c.bf16 %v548_v0, %v547_v62  ;;  %v541_v19 = vmax.f32 %v509_v11, 0.0 }
  0xcc   : > { %v883_v5 = vpack.c.bf16 %v556_v1, %v555_v63  ;;  %v430_v6 = vpop.f32.mrf.mxu2 }
  0xcd   : > { %v450_v7 = vpop.f32.mrf.mxu3  ;;  %899 = vst [vmem:[%s1140_s14 + $0x50] sm:$0xff] %v863_v4   ;;  %v392_v8 = vpop.f32.mrf.mxu0  ;;  %v481_v16 = vmul.f32 %v1116_v20, %v430_v6 }
  0xce   : > { %v412_v9 = vpop.f32.mrf.mxu1  ;;  %903 = vst [vmem:[%s1140_s14 + $0x70] sm:$0xff] %v883_v5   ;;  %v466_v12 = vmul.f32 %v1116_v20, %v392_v8  ;;  %v489_v17 = vmul.f32 %v1116_v20, %v450_v7 }
  0xcf   : > { %v474_v13 = vmul.f32 %v1116_v20, %v412_v9  ;;  %v517_v28 = vadd.f32 %v1122_v22, %v481_v16 }
  0xd0   : > { %v502_v14 = vadd.f32 %v1122_v22, %v466_v12  ;;  %v525_v29 = vadd.f32 %v1122_v22, %v489_v17 }
  0xd1   : > { %v510_v15 = vadd.f32 %v1122_v22, %v474_v13  ;;  %v549_v34 = vmax.f32 %v517_v28, 0.0 }
  0xd2   : > { %v534_v21 = vmax.f32 %v502_v14, 0.0  ;;  %v557_v35 = vmax.f32 %v525_v29, 0.0 }
  0xd3   : > { %v542_v23 = vmax.f32 %v510_v15, 0.0 }
  0xd4   : > { %v828_v24 = vpack.c.bf16 %v534_v21, %v533_v18  ;;  %v432_v26 = vpop.f32.mrf.mxu2 }
  0xd5   : > { %v848_v25 = vpack.c.bf16 %v542_v23, %v541_v19  ;;  %v452_v27 = vpop.f32.mrf.mxu3  ;;  %v482_v30 = vmul.f32 %v1116_v20, %v432_v26 }
  0xd6   : > { %v490_v31 = vmul.f32 %v1116_v20, %v452_v27  ;;  %892 = vst [vmem:[%s1140_s14 + $0x18] sm:$0xff] %v828_v24  }
  0xd7   : > { %896 = vst [vmem:[%s1140_s14 + $0x38] sm:$0xff] %v848_v25   ;;  %v518_v32 = vadd.f32 %v1122_v22, %v482_v30 }
  0xd8   : > { %v526_v33 = vadd.f32 %v1122_v22, %v490_v31 }
  0xd9   : > { %v550_v36 = vmax.f32 %v518_v32, 0.0 }
  0xda   : > { %v558_v20 = vmax.f32 %v526_v33, 0.0 }
  0xdb   : > { %v868_v37 = vpack.c.bf16 %v550_v36, %v549_v34 }
  0xdc   : > { %v888_v38 = vpack.c.bf16 %v558_v20, %v557_v35 }
  0xdd   : > { %900 = vst [vmem:[%s1140_s14 + $0x58] sm:$0xff] %v868_v37  }
  0xde   : > { %904 = vst [vmem:[%s1140_s14 + $0x78] sm:$0xff] %v888_v38  }
  0xdf   : > { %978 = shalt.err (!%p975_p3)
}
  0xe0   : > { %s1015_s11 = smov 64   ;;  %s1016_s12 = smov 4  }
  0xe1   : > { %908 = dma.vmem_to_hbm [thread:$0]  (%p1080_p5), %s637_s19, 2048, %s639_s28, %s624_s29, %s1015_s11, %s1015_s11, %s1016_s12  }
  0xe2 PF: > { %p914_p4 = scmp.ge.s32.totalorder %s1013_s18, 2  ;;  %s653_s13 = sand.u32 1, %s1001_s15  }
  0xe3   : > { %s654_s14 = scalar_lea.sflag [#allocation3], %s653_s13 }
  0xe4   : > { %p911_p7 = pnand %p914_p4, %p1084_p6 }
  0xe6   : > { %p912_p8 = pneg %p911_p7 }
  0xe8   : > { %996 = dma.done.wait (%p912_p8), %s654_s14, 2048  }
  0xe9   : > { %998 = vsyncadd (%p912_p8), %s654_s14, 4294965248  ;;  %p14_p9 = scmp.ge.s32.totalorder %s1067_s21, 4   ;;  %s1249_s15 = smov %s1005_s16 }
  0xea   : > { %s1250_s16 = smov %s1009_s17  ;;  %s1251_s17 = smov %s1078_s24 }
  0xeb   : > { %s1252_s18 = smov %s1067_s21  ;;  %16 = sbr.rel (!%p14_p9) target bundleno = 3 (0x3), region = 71 }
  0xf0   :  { %660 = vsyncpa [#allocation3], 1 }
  0xf1   :  { %662 = vsyncpa [#allocation3 + $0x1], 1 }

</bundles_post_ra>
